<compile_context>
chip_gen: v7x
topology: tpu7x:2x2x1
jax: 0.10.0
libtpu: 0.0.40
codegen_flags: <defaults>
</compile_context>

<pallas_src>
import functools

import jax
import jax.numpy as jnp
from jax.experimental import pallas as pl
from jax.experimental.pallas import tpu as pltpu

LANES = 128
_MAX_STEP_BYTES = 8 * 1024 * 1024   # target input bytes per grid step (per buffer)
_MAX_TS = 16384                     # cap on spatial tile (keeps chunk unroll <= 128)
_MAX_TN = 256                       # rows per grid step


def _round_up(a: int, b: int) -> int:
    return ((a + b - 1) // b) * b


def _gem_kernel(p_ref, x_ref, o_ref, acc_ref, *, eps, inv_count, hw, ts):
    """One (row-tile, spatial-tile) grid step of GeM pooling.

    p_ref:   (1,)        f32 learnable exponent, SMEM
    x_ref:   (TN, TS)    input tile (rows = (b, c) pairs, lanes = spatial)
    o_ref:   (TN, 1)     pooled output rows (written on the last spatial step)
    acc_ref: (TN, 128)   lane-parallel f32 running sum of clamp(x, eps)^p
    """
    s = pl.program_id(1)

    @pl.when(s == 0)
    def _init():
        acc_ref[...] = jnp.zeros_like(acc_ref)

    p = p_ref[0].astype(jnp.float32)
    tn = acc_ref.shape[0]
    # Spatial offset of the *last* grid step (trace-time constant): lets us skip
    # the lane mask on chunks that can never run past the end of the axis.
    n_steps = (hw + ts - 1) // ts
    last_start = (n_steps - 1) * ts

    partial = jnp.zeros((tn, LANES), jnp.float32)
    for j in range(ts // LANES):
        xj = x_ref[:, j * LANES:(j + 1) * LANES].astype(jnp.float32)
        xj = jnp.maximum(xj, eps)            # clamp(min=eps): strictly positive
        xpj = jnp.exp(p * jnp.log(xj))       # x^p via EUP exp/log (safe: xj > 0)
        if last_start + (j + 1) * LANES > hw:
            # This 128-lane chunk may cover out-of-bounds spatial lanes on the
            # last step; zero their (garbage) contribution.
            lane = s * ts + j * LANES + jax.lax.broadcasted_iota(
                jnp.int32, (tn, LANES), 1)
            xpj = jnp.where(lane < hw, xpj, 0.0)
        partial = partial + xpj              # pure VPU adds, no per-step XLU work
    acc_ref[...] += partial

    @pl.when(s == pl.num_programs(1) - 1)
    def _finalize():
        total = jnp.sum(acc_ref[...], axis=-1, keepdims=True)  # one XLU reduce / row tile
        mean = total * inv_count
        o_ref[...] = jnp.exp(jnp.log(mean) / p).astype(o_ref.dtype)


def adaptive_gem(x: jnp.ndarray, p, size=(1, 1), eps: float = 1e-6,
                 max_step_bytes: int = _MAX_STEP_BYTES) -> jnp.ndarray:
    """AdaptiveGeM.forward: (mean_{h,w} clamp(x, eps)^p)^(1/p) -> (B, C, 1, 1)."""
    if tuple(size) != (1, 1):
        # TODO(synk): general adaptive output bins (ragged adaptive_avg_pool2d
        # partitions) are not implemented; only global (1, 1) GeM pooling.
        raise NotImplementedError("adaptive_gem only supports size=(1, 1)")

    B, C, H, W = x.shape
    N, HW = B * C, H * W
    x2d = x.reshape(N, HW)          # contiguous reshape: no HBM copy

    itemsize = jnp.dtype(x.dtype).itemsize
    sublanes = 8 if itemsize >= 4 else (16 if itemsize == 2 else 32)

    # Rows per step: multiple of the dtype's sublane packing, capped.
    TN = min(_MAX_TN, _round_up(N, sublanes))

    # Spatial tile: always a multiple of 128 lanes, sized so one input tile is
    # ~max_step_bytes (amortizes per-step overhead; double-buffered it stays far
    # below the VMEM limit on every TPU generation).
    budget_ts = max(LANES, (max_step_bytes // (TN * itemsize)) // LANES * LANES)
    TS = min(_round_up(HW, LANES), budget_ts, _MAX_TS)

    grid = (pl.cdiv(N, TN), pl.cdiv(HW, TS))
    p_arr = jnp.asarray(p, jnp.float32).reshape(1)

    kernel = functools.partial(
        _gem_kernel, eps=float(eps), inv_count=1.0 / float(HW), hw=HW, ts=TS)

    out = pl.pallas_call(
        kernel,
        out_shape=jax.ShapeDtypeStruct((N, 1), x.dtype),
        grid_spec=pltpu.PrefetchScalarGridSpec(
            num_scalar_prefetch=0,
            grid=grid,
            in_specs=[
                pl.BlockSpec(memory_space=pltpu.MemorySpace.SMEM),  # p (scalar)
                pl.BlockSpec((TN, TS), lambda i, s: (i, s)),        # x tile
            ],
            out_specs=pl.BlockSpec((TN, 1), lambda i, s: (i, 0)),
            scratch_shapes=[pltpu.VMEM((TN, LANES), jnp.float32)],
        ),
        # TODO(synk): on v7x, (pltpu.CORE_PARALLEL, pltpu.ARBITRARY) would shard the
        # row axis across both TensorCores (bf16 inputs are EUP-bound there); kept
        # as "parallel" here for portability across v5e/v6e/v7x.
        compiler_params=pltpu.CompilerParams(
            dimension_semantics=("parallel", "arbitrary"),
            vmem_limit_bytes=40 * 1024 * 1024,
        ),
    )(p_arr, x2d)

    return out.reshape(B, C, 1, 1)


def _gem_ref(x, p, eps):
    xf = jnp.maximum(x.astype(jnp.float32), eps)
    pf = jnp.asarray(p, jnp.float32).reshape(())
    m = jnp.mean(jnp.power(xf, pf), axis=(2, 3), keepdims=True)
    return jnp.power(m, 1.0 / pf)


if __name__ == "__main__":
    key = jax.random.PRNGKey(0)
    k1, k2, k3, k4 = jax.random.split(key, 4)

    eps = 1e-6
    p = jnp.ones((1,), jnp.float32) * 3.0   # nn.Parameter(torch.ones(1) * 3)

    # Test 1: f32, shape consistent with the module (B, C, H, W).
    x1 = jax.random.normal(k1, (2, 4, 16, 16), dtype=jnp.float32)
    out1 = jax.block_until_ready(adaptive_gem(x1, p, eps=eps))
    ref1 = _gem_ref(x1, p, eps)
    assert out1.shape == (2, 4, 1, 1)
    assert jnp.allclose(out1, ref1.astype(out1.dtype), rtol=1e-4, atol=1e-5), \
        "f32 mismatch with reference GeM pooling"

    # Test 2: bf16, row count not a multiple of the sublane packing (ragged rows).
    x2 = (jax.random.uniform(k2, (2, 3, 8, 48), dtype=jnp.float32) + 0.1)
    x2 = x2.astype(jnp.bfloat16)
    out2 = jax.block_until_ready(adaptive_gem(x2, p, eps=eps))
    ref2 = _gem_ref(x2, p, eps)
    assert out2.shape == (2, 3, 1, 1)
    assert jnp.allclose(out2.astype(jnp.float32), ref2, rtol=2e-2, atol=2e-2), \
        "bf16 mismatch with reference GeM pooling"

    # Test 3: H*W not a multiple of 128 (in-kernel lane masking) + ragged rows.
    x3 = jax.random.normal(k3, (2, 5, 7, 7), dtype=jnp.float32)
    out3 = jax.block_until_ready(adaptive_gem(x3, p, eps=eps))
    ref3 = _gem_ref(x3, p, eps)
    assert out3.shape == (2, 5, 1, 1)
    assert jnp.allclose(out3, ref3, rtol=1e-4, atol=1e-5), \
        "f32 (7x7, lane-masked) mismatch with reference GeM pooling"

    # Test 4: force several spatial grid steps with a ragged tail tile on a small
    # shape (exercises cross-step accumulation + tail lane mask).
    x4 = jax.random.normal(k4, (2, 4, 16, 33), dtype=jnp.float32)
    out4 = jax.block_until_ready(adaptive_gem(x4, p, eps=eps, max_step_bytes=8 * 1024))
    ref4 = _gem_ref(x4, p, eps)
    assert out4.shape == (2, 4, 1, 1)
    assert jnp.allclose(out4, ref4, rtol=1e-4, atol=1e-5), \
        "f32 (multi-step ragged) mismatch with reference GeM pooling"

    print("KERNEL_OK")
</pallas_src>

<mosaic_0001>
module attributes {stable_mosaic.version = 11 : i64} {
  func.func @_gem_kernel(%arg0: i32, %arg1: i32, %arg2: memref<1xf32, #tpu.memory_space<smem>>, %arg3: memref<8x256xf32, #tpu.memory_space<vmem>>, %arg4: memref<8x1xf32, #tpu.memory_space<vmem>>, %arg5: memref<8x128xf32, #tpu.memory_space<vmem>>) attributes {dimension_semantics = [#tpu.dimension_semantics<parallel>, #tpu.dimension_semantics<arbitrary>], iteration_bounds = array<i64: 1, 1>, scalar_prefetch = 0 : i64, scratch_operands = 1 : i64, tpu.core_type = #tpu.core_type<tc>, window_params = [{transform_indices = @transform_0, window_bounds = array<i64: 1>}, {transform_indices = @transform_1, window_bounds = array<i64: 8, 256>}, {transform_indices = @transform_2, window_bounds = array<i64: 8, 1>}]} {
    %c0_i32 = arith.constant 0 : i32
    %0 = arith.cmpi eq, %arg1, %c0_i32 : i32
    %1 = arith.extui %0 : i1 to i32
    %c0_i32_0 = arith.constant 0 : i32
    %2 = arith.cmpi ne, %1, %c0_i32_0 : i32
    scf.if %2 {
      %cst_12 = arith.constant 0.000000e+00 : f32
      %27 = vector.broadcast %cst_12 : f32 to vector<8x128xf32>
      %c0_13 = arith.constant 0 : index
      %c0_14 = arith.constant 0 : index
      %28 = vector.load %arg5[%c0_13, %c0_14] : memref<8x128xf32, #tpu.memory_space<vmem>>, vector<8x128xf32>
      tpu.vector_store %arg5[%c0_13, %c0_14], %27 {strides = array<i32>} : memref<8x128xf32, #tpu.memory_space<vmem>>, vector<8x128xf32>,
    } else {
    }
    %c0 = arith.constant 0 : index
    %3 = memref.load %arg2[%c0] : memref<1xf32, #tpu.memory_space<smem>>
    %cst = arith.constant 0.000000e+00 : f32
    %4 = vector.broadcast %cst : f32 to vector<8x128xf32>
    %c0_1 = arith.constant 0 : index
    %c0_2 = arith.constant 0 : index
    %5 = vector.load %arg3[%c0_1, %c0_2] : memref<8x256xf32, #tpu.memory_space<vmem>>, vector<8x128xf32>
    %cst_3 = arith.constant 9.99999997E-7 : f32
    %6 = vector.broadcast %cst_3 : f32 to vector<8x128xf32>
    %7 = arith.maximumf %5, %6 : vector<8x128xf32>
    %8 = math.log %7 : vector<8x128xf32>
    %9 = vector.broadcast %3 : f32 to vector<8x128xf32>
    %10 = arith.mulf %9, %8 : vector<8x128xf32>
    %11 = math.exp %10 : vector<8x128xf32>
    %12 = arith.addf %4, %11 : vector<8x128xf32>
    %c0_4 = arith.constant 0 : index
    %c128 = arith.constant 128 : index
    %13 = vector.load %arg3[%c0_4, %c128] : memref<8x256xf32, #tpu.memory_space<vmem>>, vector<8x128xf32>
    %cst_5 = arith.constant 9.99999997E-7 : f32
    %14 = vector.broadcast %cst_5 : f32 to vector<8x128xf32>
    %15 = arith.maximumf %13, %14 : vector<8x128xf32>
    %16 = math.log %15 : vector<8x128xf32>
    %17 = vector.broadcast %3 : f32 to vector<8x128xf32>
    %18 = arith.mulf %17, %16 : vector<8x128xf32>
    %19 = math.exp %18 : vector<8x128xf32>
    %20 = arith.addf %12, %19 : vector<8x128xf32>
    %c0_6 = arith.constant 0 : index
    %c0_7 = arith.constant 0 : index
    %21 = vector.load %arg5[%c0_6, %c0_7] : memref<8x128xf32, #tpu.memory_space<vmem>>, vector<8x128xf32>
    %22 = arith.addf %21, %20 : vector<8x128xf32>
    %c0_8 = arith.constant 0 : index
    %c0_9 = arith.constant 0 : index
    %23 = vector.load %arg5[%c0_8, %c0_9] : memref<8x128xf32, #tpu.memory_space<vmem>>, vector<8x128xf32>
    tpu.vector_store %arg5[%c0_8, %c0_9], %22 {strides = array<i32>} : memref<8x128xf32, #tpu.memory_space<vmem>>, vector<8x128xf32>,
    %c0_i32_10 = arith.constant 0 : i32
    %24 = arith.cmpi eq, %arg1, %c0_i32_10 : i32
    %25 = arith.extui %24 : i1 to i32
    %c0_i32_11 = arith.constant 0 : i32
    %26 = arith.cmpi ne, %25, %c0_i32_11 : i32
    scf.if %26 {
      %c0_12 = arith.constant 0 : index
      %c0_13 = arith.constant 0 : index
      %27 = vector.load %arg5[%c0_12, %c0_13] : memref<8x128xf32, #tpu.memory_space<vmem>>, vector<8x128xf32>
      %cst_14 = arith.constant dense<0.000000e+00> : vector<8xf32>
      %28 = vector.multi_reduction <add>, %27, %cst_14 [1] : vector<8x128xf32> to vector<8xf32>
      %29 = vector.shape_cast %28 : vector<8xf32> to vector<8x1xf32>
      %cst_15 = arith.constant 3.906250e-03 : f32
      %30 = vector.broadcast %cst_15 : f32 to vector<8x1xf32>
      %31 = arith.mulf %29, %30 : vector<8x1xf32>
      %32 = math.log %31 : vector<8x1xf32>
      %33 = vector.broadcast %3 : f32 to vector<8x1xf32>
      %34 = arith.divf %32, %33 : vector<8x1xf32>
      %35 = math.exp %34 : vector<8x1xf32>
      %c0_16 = arith.constant 0 : index
      %c0_17 = arith.constant 0 : index
      %36 = vector.load %arg4[%c0_16, %c0_17] : memref<8x1xf32, #tpu.memory_space<vmem>>, vector<8x1xf32>
      tpu.vector_store %arg4[%c0_16, %c0_17], %35 {strides = array<i32>} : memref<8x1xf32, #tpu.memory_space<vmem>>, vector<8x1xf32>,
    } else {
    }
    return
  }
  func.func @transform_0(%arg0: i32, %arg1: i32) -> i32 {
    %c0_i32 = arith.constant 0 : i32
    %c0_i32_0 = arith.constant 0 : i32
    return %c0_i32 : i32
  }
  func.func @transform_1(%arg0: i32, %arg1: i32) -> (i32, i32) {
    %c0_i32 = arith.constant 0 : i32
    return %arg0, %arg1 : i32, i32
  }
  func.func @transform_2(%arg0: i32, %arg1: i32) -> (i32, i32) {
    %c0_i32 = arith.constant 0 : i32
    %c0_i32_0 = arith.constant 0 : i32
    return %arg0, %c0_i32 : i32, i32
  }
}

</mosaic_0001>

<bundles_post_ra>
// kernel: tpu_custom_call.1
= control target key start
LH: loop header
LB: loop body
LE: loop exit
PB: predicated region body
PF: predicated region fallthrough
CT: control target
= control target key end

     0   :  { %8 = vsyncpa [#allocation5], 0  ;;  %s109_s9 = smov [#allocation4]   ;;  %s143_s0 = inlined_call_operand.<no memory space> [shape: f32[1], index: 0, kind: input, shape index: {}]   ;;  %s144_s1 = inlined_call_operand.hbm [shape: f32[8,256], index: 1, kind: input, shape index: {}]   ;;  %s145_s2 = inlined_call_operand.vmem [shape: f32[8,1], index: 2, kind: output, shape index: {}]  }
   0x1   :  { %s17_s10 = sshll.u32 %s109_s9, 4  ;;  %s85_s13 = scalar_lea.hbm %s144_s1, 256  ;;  %s18_s10 = int_to_ptr.vmem [resolvable:$true] %s17_s10 }
   0x2   :  { %p86_p0 = scmp.ne.s32.totalorder %s144_s1, %s85_s13  ;;  %p89_p1 = scmp.lt.u32.totalorder %s85_s13, %s144_s1 }
   0x4   :  { %p91_p2 = pnand %p89_p1, %p86_p0 }
   0x6   :  { %94 = shalt.err (!%p91_p2)
}
   0x7   :  { %s95_s18 = scalar_lea.vmem %s18_s10, 256  ;;  %p100_p4 = scmp.lt.s32.totalorder %s18_s10, %s18_s10 }
   0x8   :  { %p96_p3 = scmp.ne.s32.totalorder %s18_s10, %s95_s18  ;;  %p101_p5 = scmp.lt.s32.totalorder %s95_s18, %s95_s18 }
   0xa   :  { %p102_p6 = por %p101_p5, %p100_p4 }
   0xc   :  { %p103_p7 = pnand %p102_p6, %p96_p3 }
   0xe   :  { %106 = shalt.err (!%p103_p7)
}
   0xf   :  { %20 = dma.hbm_to_vmem [thread:$0]  %s144_s1, 256, %s18_s10, [#allocation5]  }
  0x10   :  { %107 = dma.done.wait [#allocation5], 256  }
  0x11   :  { %108 = vsyncadd [#allocation5], 4294967040  ;;  %v30_v0 = vld [vmem:[#allocation4] sm:$0xff]  ;;  %v39_v1 = vld [vmem:[#allocation4 + $0x8] sm:$0xff]  ;;  %v34_v5 = vstv %s143_s0  ;;  %vm63_vm0 = vcmask 7168  }
  0x12   :  { %v31_v2 = vmax.f32 %v30_v0, 1e-06  ;;  %v40_v3 = vmax.f32 %v39_v1, 1e-06 }
  0x14   :  { %71 = vlog2.f32 %v31_v2 }
  0x15   :  { %73 = vlog2.f32 %v40_v3 }
  0x1e   :  { %v72_v4 = vpop.eup %71 }
  0x1f   :  { %v74_v6 = vpop.eup %73  ;;  %v33_v7 = vmul.f32 0.6931472, %v72_v4 }
  0x20   :  { %v42_v8 = vmul.f32 0.6931472, %v74_v6 }
  0x21   :  { %v35_v9 = vmul.f32 %v34_v5, %v33_v7 }
  0x22   :  { %v43_v10 = vmul.f32 %v42_v8, %v34_v5 }
  0x23   :  { %v36_v11 = vmul.f32 1.442695, %v35_v9 }
  0x24   :  { %v44_v12 = vmul.f32 1.442695, %v43_v10 }
  0x25   :  { %75 = vpow2.f32 %v36_v11 }
  0x26   :  { %77 = vpow2.f32 %v44_v12 }
  0x27   :  { %79 = vrcp.f32 %v34_v5 }
  0x2f   :  { %v76_v13 = vpop.eup %75 }
  0x30   :  { %v78_v14 = vpop.eup %77 }
  0x31   :  { %v46_v15 = vadd.f32 %v78_v14, %v76_v13  ;;  %v80_v18 = vpop.eup %79 }
  0x33   :  { %54 = vadd.xlane.f32.xlu0 %v46_v15 }
  0xc0   :  { %v55_v16 = vpop.xlane.xlu0 %54 }
  0xc1   :  { %v56_v17 = vmul.f32 0.00390625, %v55_v16 }
  0xc3   :  { %81 = vlog2.f32 %v56_v17 }
  0xcd   :  { %v82_v19 = vpop.eup %81 }
  0xce   :  { %v58_v20 = vmul.f32 0.6931472, %v82_v19 }
  0xd0   :  { %v60_v21 = vmul.f32 %v80_v18, %v58_v20 }
  0xd2   :  { %v61_v22 = vmul.f32 1.442695, %v60_v21 }
  0xd4   :  { %83 = vpow2.f32 %v61_v22 }
  0xde   :  { %v84_v23 = vpop.eup %83 }
  0xdf   :  { %64 = vst.msk [vmem:[%s145_s2] sm:$0xff] %vm63_vm0, %v84_v23 }
  0xe0   :  { %69 = vsyncpa [#allocation5], 1 }

</bundles_post_ra>
